<compile_context>
chip_gen: v6e
topology: v6e:2x2x1
jax: 0.10.0
libtpu: 0.0.40
codegen_flags: <defaults>
</compile_context>

<pallas_src>
import functools

import jax
import jax.numpy as jnp
from jax import lax
from jax.experimental import pallas as pl
from jax.experimental.pallas import tpu as pltpu


def _pam_cat_kernel(x_ref, wc_ref, bc_ref, wq_ref, bq_ref, wk_ref, bk_ref,
                    wv_ref, bv_ref, wp_ref, bp_ref, o_ref,
                    *, num_heads, head_dim, batch_tile, eps, approx):
    Bt, N, C = x_ref.shape
    cdt = wq_ref.dtype                      # MXU operand dtype (bf16 or f32)
    scale = head_dim ** -0.5

    # Load weights once (constant block index across the grid -> resident).
    wc = wc_ref[...]
    wq = wq_ref[...]
    wk = wk_ref[...]
    wv = wv_ref[...]
    wp = wp_ref[...]
    bc = bc_ref[...]                        # (1, M)  -- broadcast over rows
    bq = bq_ref[...]                        # (1, C)
    bk = bk_ref[...]
    bv = bv_ref[...]
    bp = bp_ref[...]

    # ---- flatten the batch tile: fat LHS rows + lane/sublane-dense slab ----
    x_m = x_ref[...].reshape(Bt * N, C).astype(cdt)                 # (Bt*N, C)

    # Cluster logits + q for the whole slab (one MXU call each).
    c_all = jnp.dot(x_m, wc, preferred_element_type=jnp.float32) + bc
    c_all = jax.nn.sigmoid(c_all)                                   # (Bt*N, M) f32
    q_all = jnp.dot(x_m, wq, preferred_element_type=jnp.float32) + bq
    q_all = (q_all * scale).astype(cdt)                             # pre-scaled

    for b in range(batch_tile):                                     # static unroll
        rows = slice(b * N, (b + 1) * N)
        xb = x_m[rows]                                              # (N, C)
        cb = c_all[rows]                                            # (N, M) f32

        # -------- cluster aggregation: explicit cheap transpose of c, then a
        # plain MXU matmul (no hidden dim0/dim0 contraction relayout). --------
        cbT = cb.T.astype(cdt)                                      # (M, N)
        zb = jnp.dot(cbT, xb, preferred_element_type=jnp.float32)   # (M, C) f32
        # L2 norm over channels: rsqrt (EUP) instead of sqrt + divide.
        sumsq = jnp.sum(zb * zb, axis=-1, keepdims=True)
        zb = zb * lax.rsqrt(jnp.maximum(sumsq, eps * eps))
        zb_m = zb.astype(cdt)

        kb = (jnp.dot(zb_m, wk, preferred_element_type=jnp.float32)
              + bk).astype(cdt)                                     # (M, C)
        vb = (jnp.dot(zb_m, wv, preferred_element_type=jnp.float32)
              + bv).astype(cdt)                                     # (M, C)
        qb = q_all[rows]                                            # (N, C)

        # -------- multi-head attention with the output projection fused into
        # the head loop (no concatenate; final matmul lane width is C). -------
        y = jnp.zeros((N, C), jnp.float32)
        for h in range(num_heads):                                  # static unroll
            cols = slice(h * head_dim, (h + 1) * head_dim)
            qh = qb[:, cols]                                        # (N, Dh)
            kh = kb[:, cols]                                        # (M, Dh)
            vh = vb[:, cols]                                        # (M, Dh)
            s = lax.dot_general(qh, kh,
                                dimension_numbers=(((1,), (1,)), ((), ())),
                                preferred_element_type=jnp.float32)  # (N, M)
            s = s - jnp.max(s, axis=-1, keepdims=True)
            p = jnp.exp(s)
            p = p * pl.reciprocal(jnp.sum(p, axis=-1, keepdims=True),
                                  approx=approx)
            head = jnp.dot(p.astype(cdt), vh,
                           preferred_element_type=jnp.float32)       # (N, Dh)
            y = y + jnp.dot(head.astype(cdt), wp[cols, :],
                            preferred_element_type=jnp.float32)      # (N, C)

        o_ref[b] = (y + bp).astype(o_ref.dtype)


def pam_cat_attention(x, params, num_heads, *, batch_tile=None,
                      mxu_dtype=jnp.float32, approx_recip=True):
    B, N, C = x.shape
    M = params["wc"].shape[1]
    assert C % num_heads == 0
    head_dim = C // num_heads

    if batch_tile is None:
        # Fold batches into one block (lane/sublane-dense output, fat MXU LHS)
        # while keeping >=2 grid steps when possible (v7x has 2 TensorCores).
        divisors = [d for d in range(1, B + 1) if B % d == 0]
        fits = [d for d in divisors if d * N * C * 4 <= 2 * 1024 * 1024]
        multi = [d for d in fits if B // d >= 2]
        batch_tile = max(multi) if multi else max(fits)
    assert B % batch_tile == 0
    grid = (B // batch_tile,)

    wdt = jnp.dtype(mxu_dtype)

    def full(shape):
        nd = len(shape)
        return pl.BlockSpec(shape, lambda g, _nd=nd: (0,) * _nd)

    kernel = functools.partial(_pam_cat_kernel, num_heads=num_heads,
                               head_dim=head_dim, batch_tile=batch_tile,
                               eps=1e-12, approx=approx_recip)

    # Advisory cost estimate for XLA's scheduler.
    flops = (2 * B * N * C * M            # cluster linear
             + 2 * B * M * N * C          # cluster aggregation
             + 2 * B * N * C * C          # q
             + 4 * B * M * C * C          # k, v
             + 4 * B * num_heads * N * M * head_dim  # scores + attn @ v
             + 2 * B * N * C * C)         # output projection
    transcendentals = (B * N * M                    # sigmoid
                       + B * num_heads * N * M      # exp
                       + B * M                      # rsqrt
                       + B * num_heads * N)         # reciprocal
    bytes_accessed = (2 * B * N * C * 4
                      + (C * M + 4 * C * C) * wdt.itemsize
                      + (M + 4 * C) * 4)

    return pl.pallas_call(
        kernel,
        out_shape=jax.ShapeDtypeStruct((B, N, C), x.dtype),
        grid_spec=pltpu.PrefetchScalarGridSpec(
            num_scalar_prefetch=0,
            grid=grid,
            in_specs=[
                pl.BlockSpec((batch_tile, N, C), lambda g: (g, 0, 0)),  # x
                full((C, M)), full((1, M)),                             # cluster
                full((C, C)), full((1, C)),                             # q
                full((C, C)), full((1, C)),                             # k
                full((C, C)), full((1, C)),                             # v
                full((C, C)), full((1, C)),                             # proj
            ],
            out_specs=pl.BlockSpec((batch_tile, N, C), lambda g: (g, 0, 0)),
        ),
        compiler_params=pltpu.CompilerParams(
            dimension_semantics=("parallel",),
            vmem_limit_bytes=32 * 1024 * 1024),
        cost_estimate=pl.CostEstimate(flops=int(flops),
                                      transcendentals=int(transcendentals),
                                      bytes_accessed=int(bytes_accessed)),
    )(x,
      params["wc"].astype(wdt), params["bc"].astype(jnp.float32),
      params["wq"].astype(wdt), params["bq"].astype(jnp.float32),
      params["wk"].astype(wdt), params["bk"].astype(jnp.float32),
      params["wv"].astype(wdt), params["bv"].astype(jnp.float32),
      params["wp"].astype(wdt), params["bp"].astype(jnp.float32))


def reference(x, p, num_heads):
    """Pure-JAX f32 reference replicating the PyTorch forward (fused_attn path)."""
    B, N, C = x.shape
    Dh = C // num_heads
    c = x @ p["wc"] + p["bc"][0]                                   # (B, N, M)
    c = jax.nn.sigmoid(jnp.swapaxes(c, -1, -2))                    # (B, M, N)
    z = jnp.einsum('bmn,bnc->bmc', c, x)                           # (B, M, C)
    z = z / jnp.maximum(
        jnp.sqrt(jnp.sum(z * z, axis=-1, keepdims=True)), 1e-12)
    q = (x @ p["wq"] + p["bq"][0]).reshape(B, N, num_heads, Dh).transpose(0, 2, 1, 3)
    k = (z @ p["wk"] + p["bk"][0]).reshape(B, -1, num_heads, Dh).transpose(0, 2, 1, 3)
    v = (z @ p["wv"] + p["bv"][0]).reshape(B, -1, num_heads, Dh).transpose(0, 2, 1, 3)
    attn = jax.nn.softmax((q * Dh ** -0.5) @ jnp.swapaxes(k, -1, -2), axis=-1)
    o = (attn @ v).transpose(0, 2, 1, 3).reshape(B, N, C)
    return o @ p["wp"] + p["bp"][0]


def init_params(key, dim, num_clusters):
    """Deterministic nn.Linear-style init: U(-1/sqrt(fan_in), 1/sqrt(fan_in))."""
    names = [("wc", dim, num_clusters), ("wq", dim, dim), ("wk", dim, dim),
             ("wv", dim, dim), ("wp", dim, dim)]
    keys = jax.random.split(key, 2 * len(names))
    params = {}
    for i, (name, fan_in, fan_out) in enumerate(names):
        bound = 1.0 / (fan_in ** 0.5)
        params[name] = jax.random.uniform(
            keys[2 * i], (fan_in, fan_out), jnp.float32, -bound, bound)
        params["b" + name[1:]] = jax.random.uniform(
            keys[2 * i + 1], (1, fan_out), jnp.float32, -bound, bound)
    return params


if __name__ == "__main__":
    B, N, C = 2, 16, 32          # batch, tokens, dim
    M, H = 8, 4                  # num_clusters, num_heads

    key = jax.random.PRNGKey(0)
    kx, kp = jax.random.split(key)
    x = jax.random.normal(kx, (B, N, C), jnp.float32)
    params = init_params(kp, C, M)

    ref = reference(x, params, num_heads=H)
    vis_attn = None              # fused-attn path (visualize=False) returns None

    # Exact path: f32 MXU operands, precise reciprocal, grid=(B,) (2 steps).
    out_f32 = pam_cat_attention(x, params, num_heads=H, batch_tile=1,
                                mxu_dtype=jnp.float32, approx_recip=False)
    out_f32 = jax.block_until_ready(out_f32)
    assert out_f32.shape == (B, N, C)
    assert jnp.allclose(out_f32, ref, atol=1e-4, rtol=1e-4), \
        f"f32 max abs err {jnp.max(jnp.abs(out_f32 - ref))}"

    # Fast path: bf16 MXU operands (f32 accumulation / softmax / L2-norm),
    # approx reciprocal, whole (B*N, C) slab folded into one grid step.
    out_bf16 = pam_cat_attention(x, params, num_heads=H, batch_tile=B,
                                 mxu_dtype=jnp.bfloat16, approx_recip=True)
    out_bf16 = jax.block_until_ready(out_bf16)
    assert out_bf16.shape == (B, N, C)
    assert jnp.allclose(out_bf16, ref, atol=7e-2, rtol=7e-2), \
        f"bf16 max abs err {jnp.max(jnp.abs(out_bf16 - ref))}"

    print("KERNEL_OK")
</pallas_src>

<mosaic_0001>
module attributes {stable_mosaic.version = 11 : i64} {
  func.func @_pam_cat_kernel(%arg0: i32, %arg1: memref<1x16x32xf32, #tpu.memory_space<vmem>>, %arg2: memref<32x8xf32, #tpu.memory_space<vmem>>, %arg3: memref<1x8xf32, #tpu.memory_space<vmem>>, %arg4: memref<32x32xf32, #tpu.memory_space<vmem>>, %arg5: memref<1x32xf32, #tpu.memory_space<vmem>>, %arg6: memref<32x32xf32, #tpu.memory_space<vmem>>, %arg7: memref<1x32xf32, #tpu.memory_space<vmem>>, %arg8: memref<32x32xf32, #tpu.memory_space<vmem>>, %arg9: memref<1x32xf32, #tpu.memory_space<vmem>>, %arg10: memref<32x32xf32, #tpu.memory_space<vmem>>, %arg11: memref<1x32xf32, #tpu.memory_space<vmem>>, %arg12: memref<1x16x32xf32, #tpu.memory_space<vmem>>) attributes {dimension_semantics = [#tpu.dimension_semantics<parallel>], iteration_bounds = array<i64: 2>, scalar_prefetch = 0 : i64, scratch_operands = 0 : i64, tpu.core_type = #tpu.core_type<tc>, window_params = [{transform_indices = @transform_0, window_bounds = array<i64: 1, 16, 32>}, {pipeline_mode = #tpu.pipeline_mode<synchronous>, transform_indices = @transform_1, window_bounds = array<i64: 32, 8>}, {pipeline_mode = #tpu.pipeline_mode<synchronous>, transform_indices = @transform_2, window_bounds = array<i64: 1, 8>}, {pipeline_mode = #tpu.pipeline_mode<synchronous>, transform_indices = @transform_3, window_bounds = array<i64: 32, 32>}, {pipeline_mode = #tpu.pipeline_mode<synchronous>, transform_indices = @transform_4, window_bounds = array<i64: 1, 32>}, {pipeline_mode = #tpu.pipeline_mode<synchronous>, transform_indices = @transform_5, window_bounds = array<i64: 32, 32>}, {pipeline_mode = #tpu.pipeline_mode<synchronous>, transform_indices = @transform_6, window_bounds = array<i64: 1, 32>}, {pipeline_mode = #tpu.pipeline_mode<synchronous>, transform_indices = @transform_7, window_bounds = array<i64: 32, 32>}, {pipeline_mode = #tpu.pipeline_mode<synchronous>, transform_indices = @transform_8, window_bounds = array<i64: 1, 32>}, {pipeline_mode = #tpu.pipeline_mode<synchronous>, transform_indices = @transform_9, window_bounds = array<i64: 32, 32>}, {pipeline_mode = #tpu.pipeline_mode<synchronous>, transform_indices = @transform_10, window_bounds = array<i64: 1, 32>}, {transform_indices = @transform_11, window_bounds = array<i64: 1, 16, 32>}]} {
    %c0 = arith.constant 0 : index
    %c0_0 = arith.constant 0 : index
    %0 = vector.load %arg2[%c0, %c0_0] : memref<32x8xf32, #tpu.memory_space<vmem>>, vector<32x8xf32>
    %c0_1 = arith.constant 0 : index
    %c0_2 = arith.constant 0 : index
    %1 = vector.load %arg4[%c0_1, %c0_2] : memref<32x32xf32, #tpu.memory_space<vmem>>, vector<32x32xf32>
    %c0_3 = arith.constant 0 : index
    %c0_4 = arith.constant 0 : index
    %2 = vector.load %arg6[%c0_3, %c0_4] : memref<32x32xf32, #tpu.memory_space<vmem>>, vector<32x32xf32>
    %c0_5 = arith.constant 0 : index
    %c0_6 = arith.constant 0 : index
    %3 = vector.load %arg8[%c0_5, %c0_6] : memref<32x32xf32, #tpu.memory_space<vmem>>, vector<32x32xf32>
    %c0_7 = arith.constant 0 : index
    %c0_8 = arith.constant 0 : index
    %4 = vector.load %arg10[%c0_7, %c0_8] : memref<32x32xf32, #tpu.memory_space<vmem>>, vector<32x32xf32>
    %c0_9 = arith.constant 0 : index
    %c0_10 = arith.constant 0 : index
    %5 = vector.load %arg3[%c0_9, %c0_10] : memref<1x8xf32, #tpu.memory_space<vmem>>, vector<1x8xf32>
    %c0_11 = arith.constant 0 : index
    %c0_12 = arith.constant 0 : index
    %6 = vector.load %arg5[%c0_11, %c0_12] : memref<1x32xf32, #tpu.memory_space<vmem>>, vector<1x32xf32>
    %c0_13 = arith.constant 0 : index
    %c0_14 = arith.constant 0 : index
    %7 = vector.load %arg7[%c0_13, %c0_14] : memref<1x32xf32, #tpu.memory_space<vmem>>, vector<1x32xf32>
    %c0_15 = arith.constant 0 : index
    %c0_16 = arith.constant 0 : index
    %8 = vector.load %arg9[%c0_15, %c0_16] : memref<1x32xf32, #tpu.memory_space<vmem>>, vector<1x32xf32>
    %c0_17 = arith.constant 0 : index
    %c0_18 = arith.constant 0 : index
    %9 = vector.load %arg11[%c0_17, %c0_18] : memref<1x32xf32, #tpu.memory_space<vmem>>, vector<1x32xf32>
    %c0_19 = arith.constant 0 : index
    %c0_20 = arith.constant 0 : index
    %c0_21 = arith.constant 0 : index
    %10 = vector.load %arg1[%c0_19, %c0_20, %c0_21] : memref<1x16x32xf32, #tpu.memory_space<vmem>>, vector<1x16x32xf32>
    %11 = vector.shape_cast %10 : vector<1x16x32xf32> to vector<16x32xf32>
    %cst = arith.constant dense<0.000000e+00> : vector<16x8xf32>
    %12 = tpu.matmul %11, %0, %cst {dimension_numbers = #tpu.dot_dimension_numbers<[1], [0], [0], [1], [0, 0, 1, 1], [], []>} : vector<16x32xf32>, vector<32x8xf32>, vector<16x8xf32> -> vector<16x8xf32>
    %13 = vector.broadcast %5 : vector<1x8xf32> to vector<16x8xf32>
    %14 = arith.addf %12, %13 : vector<16x8xf32>
    %15 = arith.negf %14 : vector<16x8xf32>
    %16 = math.exp %15 : vector<16x8xf32>
    %cst_22 = arith.constant 1.000000e+00 : f32
    %17 = vector.broadcast %cst_22 : f32 to vector<16x8xf32>
    %18 = arith.addf %17, %16 : vector<16x8xf32>
    %19 = arith.divf %17, %18 : vector<16x8xf32>
    %cst_23 = arith.constant dense<0.000000e+00> : vector<16x32xf32>
    %20 = tpu.matmul %11, %1, %cst_23 {dimension_numbers = #tpu.dot_dimension_numbers<[1], [0], [0], [1], [0, 0, 1, 1], [], []>} : vector<16x32xf32>, vector<32x32xf32>, vector<16x32xf32> -> vector<16x32xf32>
    %21 = vector.broadcast %6 : vector<1x32xf32> to vector<16x32xf32>
    %22 = arith.addf %20, %21 : vector<16x32xf32>
    %cst_24 = arith.constant 0.353553385 : f32
    %23 = vector.broadcast %cst_24 : f32 to vector<16x32xf32>
    %24 = arith.mulf %22, %23 : vector<16x32xf32>
    %25 = tpu.transpose %19, [1, 0] : vector<16x8xf32> -> vector<8x16xf32>
    %cst_25 = arith.constant dense<0.000000e+00> : vector<8x32xf32>
    %26 = tpu.matmul %25, %11, %cst_25 {dimension_numbers = #tpu.dot_dimension_numbers<[1], [0], [0], [1], [0, 0, 1, 1], [], []>} : vector<8x16xf32>, vector<16x32xf32>, vector<8x32xf32> -> vector<8x32xf32>
    %27 = arith.mulf %26, %26 : vector<8x32xf32>
    %cst_26 = arith.constant dense<0.000000e+00> : vector<8xf32>
    %28 = vector.multi_reduction <add>, %27, %cst_26 [1] : vector<8x32xf32> to vector<8xf32>
    %29 = vector.shape_cast %28 : vector<8xf32> to vector<8x1xf32>
    %cst_27 = arith.constant 1.000000e-24 : f32
    %30 = vector.broadcast %cst_27 : f32 to vector<8x1xf32>
    %31 = arith.maximumf %29, %30 : vector<8x1xf32>
    %32 = math.rsqrt %31 : vector<8x1xf32>
    %33 = vector.broadcast %32 : vector<8x1xf32> to vector<8x32xf32>
    %34 = arith.mulf %26, %33 : vector<8x32xf32>
    %cst_28 = arith.constant dense<0.000000e+00> : vector<8x32xf32>
    %35 = tpu.matmul %34, %2, %cst_28 {dimension_numbers = #tpu.dot_dimension_numbers<[1], [0], [0], [1], [0, 0, 1, 1], [], []>} : vector<8x32xf32>, vector<32x32xf32>, vector<8x32xf32> -> vector<8x32xf32>
    %36 = vector.broadcast %7 : vector<1x32xf32> to vector<8x32xf32>
    %37 = arith.addf %35, %36 : vector<8x32xf32>
    %cst_29 = arith.constant dense<0.000000e+00> : vector<8x32xf32>
    %38 = tpu.matmul %34, %3, %cst_29 {dimension_numbers = #tpu.dot_dimension_numbers<[1], [0], [0], [1], [0, 0, 1, 1], [], []>} : vector<8x32xf32>, vector<32x32xf32>, vector<8x32xf32> -> vector<8x32xf32>
    %39 = vector.broadcast %8 : vector<1x32xf32> to vector<8x32xf32>
    %40 = arith.addf %38, %39 : vector<8x32xf32>
    %cst_30 = arith.constant 0.000000e+00 : f32
    %41 = vector.broadcast %cst_30 : f32 to vector<16x32xf32>
    %42 = vector.extract_strided_slice %24 {offsets = [0, 0], sizes = [16, 8], strides = [1, 1]} : vector<16x32xf32> to vector<16x8xf32>
    %43 = vector.extract_strided_slice %37 {offsets = [0, 0], sizes = [8, 8], strides = [1, 1]} : vector<8x32xf32> to vector<8x8xf32>
    %44 = vector.extract_strided_slice %40 {offsets = [0, 0], sizes = [8, 8], strides = [1, 1]} : vector<8x32xf32> to vector<8x8xf32>
    %cst_31 = arith.constant dense<0.000000e+00> : vector<16x8xf32>
    %45 = tpu.matmul %42, %43, %cst_31 {dimension_numbers = #tpu.dot_dimension_numbers<[1], [1], [0], [0], [0, 0, 1, 0], [], []>} : vector<16x8xf32>, vector<8x8xf32>, vector<16x8xf32> -> vector<16x8xf32>
    %cst_32 = arith.constant dense<0xFF800000> : vector<16xf32>
    %46 = vector.multi_reduction <maximumf>, %45, %cst_32 [1] : vector<16x8xf32> to vector<16xf32>
    %47 = vector.shape_cast %46 : vector<16xf32> to vector<16x1xf32>
    %48 = vector.broadcast %47 : vector<16x1xf32> to vector<16x8xf32>
    %49 = arith.subf %45, %48 : vector<16x8xf32>
    %50 = math.exp %49 : vector<16x8xf32>
    %cst_33 = arith.constant dense<0.000000e+00> : vector<16xf32>
    %51 = vector.multi_reduction <add>, %50, %cst_33 [1] : vector<16x8xf32> to vector<16xf32>
    %52 = vector.shape_cast %51 : vector<16xf32> to vector<16x1xf32>
    %53 = tpu.reciprocal %52 : vector<16x1xf32> -> vector<16x1xf32>
    %54 = vector.broadcast %53 : vector<16x1xf32> to vector<16x8xf32>
    %55 = arith.mulf %50, %54 : vector<16x8xf32>
    %cst_34 = arith.constant dense<0.000000e+00> : vector<16x8xf32>
    %56 = tpu.matmul %55, %44, %cst_34 {dimension_numbers = #tpu.dot_dimension_numbers<[1], [0], [0], [1], [0, 0, 1, 1], [], []>} : vector<16x8xf32>, vector<8x8xf32>, vector<16x8xf32> -> vector<16x8xf32>
    %57 = vector.extract_strided_slice %4 {offsets = [0, 0], sizes = [8, 32], strides = [1, 1]} : vector<32x32xf32> to vector<8x32xf32>
    %cst_35 = arith.constant dense<0.000000e+00> : vector<16x32xf32>
    %58 = tpu.matmul %56, %57, %cst_35 {dimension_numbers = #tpu.dot_dimension_numbers<[1], [0], [0], [1], [0, 0, 1, 1], [], []>} : vector<16x8xf32>, vector<8x32xf32>, vector<16x32xf32> -> vector<16x32xf32>
    %59 = arith.addf %41, %58 : vector<16x32xf32>
    %60 = vector.extract_strided_slice %24 {offsets = [0, 8], sizes = [16, 8], strides = [1, 1]} : vector<16x32xf32> to vector<16x8xf32>
    %61 = vector.extract_strided_slice %37 {offsets = [0, 8], sizes = [8, 8], strides = [1, 1]} : vector<8x32xf32> to vector<8x8xf32>
    %62 = vector.extract_strided_slice %40 {offsets = [0, 8], sizes = [8, 8], strides = [1, 1]} : vector<8x32xf32> to vector<8x8xf32>
    %cst_36 = arith.constant dense<0.000000e+00> : vector<16x8xf32>
    %63 = tpu.matmul %60, %61, %cst_36 {dimension_numbers = #tpu.dot_dimension_numbers<[1], [1], [0], [0], [0, 0, 1, 0], [], []>} : vector<16x8xf32>, vector<8x8xf32>, vector<16x8xf32> -> vector<16x8xf32>
    %cst_37 = arith.constant dense<0xFF800000> : vector<16xf32>
    %64 = vector.multi_reduction <maximumf>, %63, %cst_37 [1] : vector<16x8xf32> to vector<16xf32>
    %65 = vector.shape_cast %64 : vector<16xf32> to vector<16x1xf32>
    %66 = vector.broadcast %65 : vector<16x1xf32> to vector<16x8xf32>
    %67 = arith.subf %63, %66 : vector<16x8xf32>
    %68 = math.exp %67 : vector<16x8xf32>
    %cst_38 = arith.constant dense<0.000000e+00> : vector<16xf32>
    %69 = vector.multi_reduction <add>, %68, %cst_38 [1] : vector<16x8xf32> to vector<16xf32>
    %70 = vector.shape_cast %69 : vector<16xf32> to vector<16x1xf32>
    %71 = tpu.reciprocal %70 : vector<16x1xf32> -> vector<16x1xf32>
    %72 = vector.broadcast %71 : vector<16x1xf32> to vector<16x8xf32>
    %73 = arith.mulf %68, %72 : vector<16x8xf32>
    %cst_39 = arith.constant dense<0.000000e+00> : vector<16x8xf32>
    %74 = tpu.matmul %73, %62, %cst_39 {dimension_numbers = #tpu.dot_dimension_numbers<[1], [0], [0], [1], [0, 0, 1, 1], [], []>} : vector<16x8xf32>, vector<8x8xf32>, vector<16x8xf32> -> vector<16x8xf32>
    %75 = vector.extract_strided_slice %4 {offsets = [8, 0], sizes = [8, 32], strides = [1, 1]} : vector<32x32xf32> to vector<8x32xf32>
    %cst_40 = arith.constant dense<0.000000e+00> : vector<16x32xf32>
    %76 = tpu.matmul %74, %75, %cst_40 {dimension_numbers = #tpu.dot_dimension_numbers<[1], [0], [0], [1], [0, 0, 1, 1], [], []>} : vector<16x8xf32>, vector<8x32xf32>, vector<16x32xf32> -> vector<16x32xf32>
    %77 = arith.addf %59, %76 : vector<16x32xf32>
    %78 = vector.extract_strided_slice %24 {offsets = [0, 16], sizes = [16, 8], strides = [1, 1]} : vector<16x32xf32> to vector<16x8xf32>
    %79 = vector.extract_strided_slice %37 {offsets = [0, 16], sizes = [8, 8], strides = [1, 1]} : vector<8x32xf32> to vector<8x8xf32>
    %80 = vector.extract_strided_slice %40 {offsets = [0, 16], sizes = [8, 8], strides = [1, 1]} : vector<8x32xf32> to vector<8x8xf32>
    %cst_41 = arith.constant dense<0.000000e+00> : vector<16x8xf32>
    %81 = tpu.matmul %78, %79, %cst_41 {dimension_numbers = #tpu.dot_dimension_numbers<[1], [1], [0], [0], [0, 0, 1, 0], [], []>} : vector<16x8xf32>, vector<8x8xf32>, vector<16x8xf32> -> vector<16x8xf32>
    %cst_42 = arith.constant dense<0xFF800000> : vector<16xf32>
    %82 = vector.multi_reduction <maximumf>, %81, %cst_42 [1] : vector<16x8xf32> to vector<16xf32>
    %83 = vector.shape_cast %82 : vector<16xf32> to vector<16x1xf32>
    %84 = vector.broadcast %83 : vector<16x1xf32> to vector<16x8xf32>
    %85 = arith.subf %81, %84 : vector<16x8xf32>
    %86 = math.exp %85 : vector<16x8xf32>
    %cst_43 = arith.constant dense<0.000000e+00> : vector<16xf32>
    %87 = vector.multi_reduction <add>, %86, %cst_43 [1] : vector<16x8xf32> to vector<16xf32>
    %88 = vector.shape_cast %87 : vector<16xf32> to vector<16x1xf32>
    %89 = tpu.reciprocal %88 : vector<16x1xf32> -> vector<16x1xf32>
    %90 = vector.broadcast %89 : vector<16x1xf32> to vector<16x8xf32>
    %91 = arith.mulf %86, %90 : vector<16x8xf32>
    %cst_44 = arith.constant dense<0.000000e+00> : vector<16x8xf32>
    %92 = tpu.matmul %91, %80, %cst_44 {dimension_numbers = #tpu.dot_dimension_numbers<[1], [0], [0], [1], [0, 0, 1, 1], [], []>} : vector<16x8xf32>, vector<8x8xf32>, vector<16x8xf32> -> vector<16x8xf32>
    %93 = vector.extract_strided_slice %4 {offsets = [16, 0], sizes = [8, 32], strides = [1, 1]} : vector<32x32xf32> to vector<8x32xf32>
    %cst_45 = arith.constant dense<0.000000e+00> : vector<16x32xf32>
    %94 = tpu.matmul %92, %93, %cst_45 {dimension_numbers = #tpu.dot_dimension_numbers<[1], [0], [0], [1], [0, 0, 1, 1], [], []>} : vector<16x8xf32>, vector<8x32xf32>, vector<16x32xf32> -> vector<16x32xf32>
    %95 = arith.addf %77, %94 : vector<16x32xf32>
    %96 = vector.extract_strided_slice %24 {offsets = [0, 24], sizes = [16, 8], strides = [1, 1]} : vector<16x32xf32> to vector<16x8xf32>
    %97 = vector.extract_strided_slice %37 {offsets = [0, 24], sizes = [8, 8], strides = [1, 1]} : vector<8x32xf32> to vector<8x8xf32>
    %98 = vector.extract_strided_slice %40 {offsets = [0, 24], sizes = [8, 8], strides = [1, 1]} : vector<8x32xf32> to vector<8x8xf32>
    %cst_46 = arith.constant dense<0.000000e+00> : vector<16x8xf32>
    %99 = tpu.matmul %96, %97, %cst_46 {dimension_numbers = #tpu.dot_dimension_numbers<[1], [1], [0], [0], [0, 0, 1, 0], [], []>} : vector<16x8xf32>, vector<8x8xf32>, vector<16x8xf32> -> vector<16x8xf32>
    %cst_47 = arith.constant dense<0xFF800000> : vector<16xf32>
    %100 = vector.multi_reduction <maximumf>, %99, %cst_47 [1] : vector<16x8xf32> to vector<16xf32>
    %101 = vector.shape_cast %100 : vector<16xf32> to vector<16x1xf32>
    %102 = vector.broadcast %101 : vector<16x1xf32> to vector<16x8xf32>
    %103 = arith.subf %99, %102 : vector<16x8xf32>
    %104 = math.exp %103 : vector<16x8xf32>
    %cst_48 = arith.constant dense<0.000000e+00> : vector<16xf32>
    %105 = vector.multi_reduction <add>, %104, %cst_48 [1] : vector<16x8xf32> to vector<16xf32>
    %106 = vector.shape_cast %105 : vector<16xf32> to vector<16x1xf32>
    %107 = tpu.reciprocal %106 : vector<16x1xf32> -> vector<16x1xf32>
    %108 = vector.broadcast %107 : vector<16x1xf32> to vector<16x8xf32>
    %109 = arith.mulf %104, %108 : vector<16x8xf32>
    %cst_49 = arith.constant dense<0.000000e+00> : vector<16x8xf32>
    %110 = tpu.matmul %109, %98, %cst_49 {dimension_numbers = #tpu.dot_dimension_numbers<[1], [0], [0], [1], [0, 0, 1, 1], [], []>} : vector<16x8xf32>, vector<8x8xf32>, vector<16x8xf32> -> vector<16x8xf32>
    %111 = vector.extract_strided_slice %4 {offsets = [24, 0], sizes = [8, 32], strides = [1, 1]} : vector<32x32xf32> to vector<8x32xf32>
    %cst_50 = arith.constant dense<0.000000e+00> : vector<16x32xf32>
    %112 = tpu.matmul %110, %111, %cst_50 {dimension_numbers = #tpu.dot_dimension_numbers<[1], [0], [0], [1], [0, 0, 1, 1], [], []>} : vector<16x8xf32>, vector<8x32xf32>, vector<16x32xf32> -> vector<16x32xf32>
    %113 = arith.addf %95, %112 : vector<16x32xf32>
    %114 = vector.broadcast %9 : vector<1x32xf32> to vector<16x32xf32>
    %115 = arith.addf %113, %114 : vector<16x32xf32>
    %c0_51 = arith.constant 0 : index
    %c0_52 = arith.constant 0 : index
    %c0_53 = arith.constant 0 : index
    %116 = vector.load %arg12[%c0_51, %c0_52, %c0_53] : memref<1x16x32xf32, #tpu.memory_space<vmem>>, vector<1x16x32xf32>
    %117 = vector.shape_cast %116 : vector<1x16x32xf32> to vector<16x32xf32>
    %118 = vector.shape_cast %115 : vector<16x32xf32> to vector<1x16x32xf32>
    tpu.vector_store %arg12[%c0_51, %c0_52, %c0_53], %118 {strides = array<i32>} : memref<1x16x32xf32, #tpu.memory_space<vmem>>, vector<1x16x32xf32>,
    return
  }
  func.func @transform_0(%arg0: i32) -> (i32, i32, i32) {
    %c0_i32 = arith.constant 0 : i32
    %c0_i32_0 = arith.constant 0 : i32
    %c0_i32_1 = arith.constant 0 : i32
    return %arg0, %c0_i32, %c0_i32_0 : i32, i32, i32
  }
  func.func @transform_1(%arg0: i32) -> (i32, i32) {
    %c0_i32 = arith.constant 0 : i32
    %c0_i32_0 = arith.constant 0 : i32
    %c0_i32_1 = arith.constant 0 : i32
    return %c0_i32, %c0_i32_0 : i32, i32
  }
  func.func @transform_2(%arg0: i32) -> (i32, i32) {
    %c0_i32 = arith.constant 0 : i32
    %c0_i32_0 = arith.constant 0 : i32
    %c0_i32_1 = arith.constant 0 : i32
    return %c0_i32, %c0_i32_0 : i32, i32
  }
  func.func @transform_3(%arg0: i32) -> (i32, i32) {
    %c0_i32 = arith.constant 0 : i32
    %c0_i32_0 = arith.constant 0 : i32
    %c0_i32_1 = arith.constant 0 : i32
    return %c0_i32, %c0_i32_0 : i32, i32
  }
  func.func @transform_4(%arg0: i32) -> (i32, i32) {
    %c0_i32 = arith.constant 0 : i32
    %c0_i32_0 = arith.constant 0 : i32
    %c0_i32_1 = arith.constant 0 : i32
    return %c0_i32, %c0_i32_0 : i32, i32
  }
  func.func @transform_5(%arg0: i32) -> (i32, i32) {
    %c0_i32 = arith.constant 0 : i32
    %c0_i32_0 = arith.constant 0 : i32
    %c0_i32_1 = arith.constant 0 : i32
    return %c0_i32, %c0_i32_0 : i32, i32
  }
  func.func @transform_6(%arg0: i32) -> (i32, i32) {
    %c0_i32 = arith.constant 0 : i32
    %c0_i32_0 = arith.constant 0 : i32
    %c0_i32_1 = arith.constant 0 : i32
    return %c0_i32, %c0_i32_0 : i32, i32
  }
  func.func @transform_7(%arg0: i32) -> (i32, i32) {
    %c0_i32 = arith.constant 0 : i32
    %c0_i32_0 = arith.constant 0 : i32
    %c0_i32_1 = arith.constant 0 : i32
    return %c0_i32, %c0_i32_0 : i32, i32
  }
  func.func @transform_8(%arg0: i32) -> (i32, i32) {
    %c0_i32 = arith.constant 0 : i32
    %c0_i32_0 = arith.constant 0 : i32
    %c0_i32_1 = arith.constant 0 : i32
    return %c0_i32, %c0_i32_0 : i32, i32
  }
  func.func @transform_9(%arg0: i32) -> (i32, i32) {
    %c0_i32 = arith.constant 0 : i32
    %c0_i32_0 = arith.constant 0 : i32
    %c0_i32_1 = arith.constant 0 : i32
    return %c0_i32, %c0_i32_0 : i32, i32
  }
  func.func @transform_10(%arg0: i32) -> (i32, i32) {
    %c0_i32 = arith.constant 0 : i32
    %c0_i32_0 = arith.constant 0 : i32
    %c0_i32_1 = arith.constant 0 : i32
    return %c0_i32, %c0_i32_0 : i32, i32
  }
  func.func @transform_11(%arg0: i32) -> (i32, i32, i32) {
    %c0_i32 = arith.constant 0 : i32
    %c0_i32_0 = arith.constant 0 : i32
    %c0_i32_1 = arith.constant 0 : i32
    return %arg0, %c0_i32, %c0_i32_0 : i32, i32, i32
  }
}

</mosaic_0001>

<bundles_post_ra>
// kernel: tpu_custom_call.1
= control target key start
LH: loop header
LB: loop body
LE: loop exit
PB: predicated region body
PF: predicated region fallthrough
CT: control target
= control target key end

     0   :  { %16 = vsyncpa [#allocation3], 0  ;;  %s3083_s0 = inlined_call_operand.vmem [shape: f32[2,16,32], index: 0, kind: input, shape index: {}]   ;;  %s3084_s1 = inlined_call_operand.vmem [shape: f32[32,8], index: 1, kind: input, shape index: {}]   ;;  %s3085_s2 = inlined_call_operand.vmem [shape: f32[1,8], index: 2, kind: input, shape index: {}]   ;;  %s3086_s3 = inlined_call_operand.hbm [shape: f32[32,32], index: 3, kind: input, shape index: {}]   ;;  %s3087_s4 = inlined_call_operand.vmem [shape: f32[1,32], index: 4, kind: input, shape index: {}]   ;;  %s3088_s5 = inlined_call_operand.hbm [shape: f32[32,32], index: 5, kind: input, shape index: {}]   ;;  %s3089_s6 = inlined_call_operand.vmem [shape: f32[1,32], index: 6, kind: input, shape index: {}]   ;;  %s3090_s7 = inlined_call_operand.hbm [shape: f32[32,32], index: 7, kind: input, shape index: {}]   ;;  %s3091_s8 = inlined_call_operand.vmem [shape: f32[1,32], index: 8, kind: input, shape index: {}]   ;;  %s3092_s9 = inlined_call_operand.hbm [shape: f32[32,32], index: 9, kind: input, shape index: {}]   ;;  %s3093_s10 = inlined_call_operand.vmem [shape: f32[1,32], index: 10, kind: input, shape index: {}]   ;;  %s3094_s11 = inlined_call_operand.hbm [shape: f32[2,16,32], index: 11, kind: output, shape index: {}]  }
   0x1   :  { %17 = vsyncpa [#allocation6], 0 }
   0x2   :  { %18 = vsyncpa [#allocation9], 0 }
   0x3   :  { %19 = vsyncpa [#allocation4], 0 }
   0x4   :  { %21 = vsyncpa [#allocation4 + $0x1], 0  ;;  %s2764_s17 = smov 0   ;;  %s2766_s18 = smov 0  }
   0x5   :  { %s2768_s19 = smov 0   ;;  %s2770_s20 = smov 0  }
   0x6 LB: > { %3096 = sst [smem:[#allocation15_spill]] %s2684_s19  ;;  %s2785_s21 = sadd.s32 4294967295, %s2688_s20   ;;  %s2688_s20 = sphi %s2770_s20, %s3106_s20   ;;  %s2684_s19 = sphi %s2768_s19, %s3103_s19   ;;  %s2680_s18 = sphi %s2766_s18, %s3105_s18   ;;  %s2676_s17 = sphi %s2764_s17, %s3104_s17  }
   0x7   : > { %s2145_s22 = sadd.s32 4294967294, %s2688_s20   ;;  %s2789_s23 = sadd.s32 1, %s2688_s20  }
   0x8   : > { %s270_s24 = sadd.s32 1, %s2684_s19  ;;  %s267_s25 = ssub.s32 %s2688_s20, %s2789_s23 }
   0x9   : > { %p280_p0 = scmp.ne.s32.totalorder %s2684_s19, %s2680_s18  ;;  %p268_p1 = scmp.eq.s32.totalorder %s267_s25, 0 }
   0xa   : > { %p281_p2 = scmp.eq.s32.totalorder %s2785_s21, 1  ;;  %p286_p3 = scmp.ne.s32.totalorder %s2680_s18, %s2676_s17 }
   0xb   : > { %p287_p4 = scmp.eq.s32.totalorder %s2145_s22, 1  ;;  %p2146_p7 = scmp.ge.s32.totalorder %s2688_s20, 1 }
   0xc   : > { %s2800_s26 = scalar_select %p268_p1, %s2684_s19, %s270_s24  }
   0xd   : > { %p2802_p5 = por %p281_p2, %p280_p0  ;;  %p2806_p6 = por %p287_p4, %p286_p3 }
   0xe   : > { %3097 = sst [smem:[#allocation16_spill]] %s2800_s26  ;;  %p294_p8 = scmp.lt.s32.totalorder %s2688_s20, 3 }
   0xf   : > { %p2416_p9 = scmp.eq.s32.totalorder %s2785_s21, 0  ;;  %s2690_s30 = smov [#allocation5]  }
  0x10   : > { %p2813_p10 = pnand %p2146_p7, %p294_p8  ;;  %s328_s12 = sshll.u32 %s2690_s30, 4  ;;  %s329_s12 = int_to_ptr.vmem [resolvable:$true] %s328_s12 }
  0x11   : > { %s2691_s14 = smov [#allocation2]   ;;  %s2692_s16 = smov [#allocation7]  }
  0x12   : > { %p2399_p11 = pneg %p2813_p10  ;;  %s312_s15 = sshll.u32 %s2691_s14, 4  ;;  %s313_s15 = int_to_ptr.vmem [resolvable:$true] %s312_s15 }
  0x13   : > { %s344_s22 = sshll.u32 %s2692_s16, 4  ;;  %s2523_s24 = scalar_lea.vmem %s329_s12, 512  ;;  %s345_s22 = int_to_ptr.vmem [resolvable:$true] %s344_s22 }
  0x14   : > { %p2821_p12 = pnand %p2416_p9, %p2399_p11  ;;  %p2524_p0 = scmp.ne.s32.totalorder %s329_s12, %s2523_s24 }
  0x15   : > { %p2531_p3 = scmp.lt.s32.totalorder %s329_s12, %s329_s12  ;;  %p2532_p4 = scmp.lt.s32.totalorder %s2523_s24, %s2523_s24 }
  0x16   : > { %p2514_p13 = pneg %p2821_p12 }
  0x17   : > { %p2533_p7 = por %p2532_p4, %p2531_p3 }
  0x18   : > { %p2526_p1 = pnand %p2524_p0, %p2514_p13 }
  0x1a   : > { %p2527_p2 = pneg %p2526_p1 }
  0x1c   : > { %p2534_p8 = pnand %p2533_p7, %p2527_p2 }
  0x1e   : > { %2537 = shalt.err (!%p2534_p8)
}
  0x1f   : > { %s2693_s25 = smov 128   ;;  %s2694_s30 = smov 8  }
  0x20   : > { %2405 = dma.hbm_to_vmem [thread:$0]  (!%p2821_p12), %s3088_s5, 512, %s329_s12, [#allocation6], %s2693_s25, %s2693_s25, %s2694_s30  }
  0x21   : > { %s2549_s26 = scalar_lea.vmem %s313_s15, 512  ;;  %p2557_p2 = scmp.lt.s32.totalorder %s313_s15, %s313_s15 }
  0x22   : > { %p2550_p11 = scmp.ne.s32.totalorder %s313_s15, %s2549_s26  ;;  %p2558_p3 = scmp.lt.s32.totalorder %s2549_s26, %s2549_s26 }
  0x24   : > { %p2552_p0 = pnand %p2550_p11, %p2514_p13  ;;  %p2559_p4 = por %p2558_p3, %p2557_p2 }
  0x26   : > { %p2553_p1 = pneg %p2552_p0 }
  0x28   : > { %p2560_p7 = pnand %p2559_p4, %p2553_p1 }
  0x2a   : > { %2563 = shalt.err (!%p2560_p7)
}
  0x2b   : > { %2402 = dma.hbm_to_vmem [thread:$0]  (!%p2821_p12), %s3086_s3, 512, %s313_s15, [#allocation3], %s2693_s25, %s2693_s25, %s2694_s30  }
  0x2c   : > { %s2575_s12 = scalar_lea.vmem %s345_s22, 512  ;;  %p2583_p2 = scmp.lt.s32.totalorder %s345_s22, %s345_s22 }
  0x2d   : > { %p2576_p8 = scmp.ne.s32.totalorder %s345_s22, %s2575_s12  ;;  %p2584_p1 = scmp.lt.s32.totalorder %s2575_s12, %s2575_s12 }
  0x2f   : > { %p2578_p11 = pnand %p2576_p8, %p2514_p13  ;;  %p2585_p3 = por %p2584_p1, %p2583_p2 }
  0x31   : > { %p2579_p0 = pneg %p2578_p11 }
  0x33   : > { %p2586_p4 = pnand %p2585_p3, %p2579_p0 }
  0x35   : > { %2589 = shalt.err (!%p2586_p4)
}
  0x36   : > { %2408 = dma.hbm_to_vmem [thread:$0]  (!%p2821_p12), %s3090_s7, 512, %s345_s22, [#allocation6], %s2693_s25, %s2693_s25, %s2694_s30  }
  0x37   : > { %s2695_s15 = smov [#allocation8]  }
  0x38   : > { %s360_s14 = sshll.u32 %s2695_s15, 4  ;;  %s361_s14 = int_to_ptr.vmem [resolvable:$true] %s360_s14 }
  0x39   : > { %s2601_s16 = scalar_lea.vmem %s361_s14, 512  ;;  %p2609_p0 = scmp.lt.s32.totalorder %s361_s14, %s361_s14 }
  0x3a   : > { %p2602_p7 = scmp.ne.s32.totalorder %s361_s14, %s2601_s16  ;;  %p2610_p2 = scmp.lt.s32.totalorder %s2601_s16, %s2601_s16 }
  0x3c   : > { %p2604_p8 = pnand %p2602_p7, %p2514_p13  ;;  %p2611_p1 = por %p2610_p2, %p2609_p0 }
  0x3e   : > { %p2605_p11 = pneg %p2604_p8 }
  0x40   : > { %p2612_p3 = pnand %p2611_p1, %p2605_p11 }
  0x42   : > { %2615 = shalt.err (!%p2612_p3)
}
  0x43   : > { %2411 = dma.hbm_to_vmem [thread:$0]  (!%p2821_p12), %s3092_s9, 512, %s361_s14, [#allocation9], %s2693_s25, %s2693_s25, %s2694_s30  }
  0x44   : > { %387 = sbr.rel (%p2813_p10) target bundleno = 3253 (0xcb5), region = 64 }
  0x49   : > { %2659 = dma.done.wait (%p2416_p9), [#allocation3], 512  }
  0x4a   : > { %2661 = vsyncadd (%p2416_p9), [#allocation3], 4294966784 }
  0x4b   : > { %2663 = dma.done.wait (%p2416_p9), [#allocation6], 1024  }
  0x4c   : > { %2665 = vsyncadd (%p2416_p9), [#allocation6], 4294966272 }
  0x4d   : > { %2667 = dma.done.wait (%p2416_p9), [#allocation9], 512  }
  0x4e   : > { %2669 = vsyncadd (%p2416_p9), [#allocation9], 4294966784  ;;  %p439_p10 = scmp.lt.s32.totalorder %s2785_s21, 1  ;;  %vm477_vm0 = vcmask 261120   ;;  %v447_v0 = vld [vmem:[%s3084_s1 + $0x18] sm:$0xff]  ;;  %v446_v1 = vld [vmem:[%s3084_s1 + $0x10] sm:$0xff] }
  0x4f   : > { %2270 = vmatprep.subr.mxu0 %v447_v0  ;;  %v445_v3 = vld [vmem:[%s3084_s1 + $0x8] sm:$0xff]  ;;  %v444_v4 = vld [vmem:[%s3084_s1] sm:$0xff]  ;;  %v2696_v6 = vmov 0.0   ;;  %vm2697_vm1 = vmmov 0   ;;  %vm686_vm2 = vcmask 130048   ;;  %v451_v25 = vld [vmem:[#allocation2 + $0x18] sm:$0xff] }
  0x50   : > { %s440_s29 = scalar_select %p439_p10, %s2785_s21, 1  ;;  %2271 = vmatpush3.msra.mxu0 %v447_v0  ;;  %v2160_v7 = vld [vmem:[%s3085_s2] ss:$0 sm:$0xff]  ;;  %2281 = vmatprep.subr.mxu1 %v451_v25  ;;  %v450_v26 = vld [vmem:[#allocation2 + $0x10] sm:$0xff]  ;;  %v449_v27 = vld [vmem:[#allocation2 + $0x8] sm:$0xff]  ;;  %vm922_vm3 = vcmask 64512  }
  0x51   : > { %2272 = vmatprep.subr.mxu0 %v446_v1  ;;  %2282 = vmatpush3.msra.mxu1 %v451_v25  ;;  %v459_v28 = vld [vmem:[#allocation7 + $0x18] sm:$0xff]  ;;  %v448_v29 = vld [vmem:[#allocation2] sm:$0xff]  ;;  %v458_v30 = vld [vmem:[#allocation7 + $0x10] sm:$0xff]  ;;  %s2698_s19 = smov 120   ;;  %s2699_s22 = smov 112  }
  0x52   : > { %s2207_s13 = sshll.u32 %s440_s29, 4  ;;  %2273 = vmatpush3.msra.mxu0 %v446_v1  ;;  %2283 = vmatprep.subr.mxu1 %v450_v26  ;;  %v457_v31 = vld [vmem:[#allocation7 + $0x8] sm:$0xff]  ;;  %v455_v32 = vld [vmem:[#allocation5 + $0x18] sm:$0xff]  ;;  %v454_v33 = vld [vmem:[#allocation5 + $0x10] sm:$0xff]  ;;  %s2700_s24 = smov 104  }
  0x53   : > { %s443_s12 = scalar_lea.vmem %s3083_s0, %s2207_s13  ;;  %2274 = vmatprep.subr.mxu0 %v445_v3  ;;  %2284 = vmatpush3.msra.mxu1 %v450_v26  ;;  %v456_v34 = vld [vmem:[#allocation7] sm:$0xff]  ;;  %v453_v35 = vld [vmem:[#allocation5 + $0x8] sm:$0xff]  ;;  %s436_s29 = sand.u32 1, %s2680_s18  }
  0x54   : > { %v469_v2 = vld [vmem:[%s443_s12] sm:$0xff]  ;;  %2275 = vmatpush3.msra.mxu0 %v445_v3  ;;  %v470_v5 = vld [vmem:[%s443_s12 + $0x8] sm:$0xff]  ;;  %2285 = vmatprep.subr.mxu1 %v449_v27  ;;  %s2157_s13 = sshll.u32 %s436_s29, 4  ;;  %s2208_s12 = sshll.u32 %s2785_s21, 8 }
  0x55   : > { %2278 = vmatprep.mubr.msk.f32.mxu0 %vm477_vm0, %v469_v2  ;;  %2289 = vmatprep.mubr.msk.f32.mxu1 %vm477_vm0, %v469_v2  ;;  %v452_v36 = vld [vmem:[#allocation5] sm:$0xff]  ;;  %s3037_s16 = scalar_lea.hbm %s3094_s11, %s2208_s12  ;;  %s3043_s21 = scalar_lea.sflag [#allocation4], %s436_s29 }
  0x56   : > { %2276 = vmatprep.subr.mxu0 %v444_v4  ;;  %2286 = vmatpush3.msra.mxu1 %v449_v27  ;;  %v2165_v41 = vld [vmem:[%s3087_s4] ss:$0 sm:$0xff] }
  0x57   : > { %2277 = vmatpush3.msra.mxu0 %v444_v4  ;;  %2287 = vmatprep.subr.mxu1 %v448_v29  ;;  %v2169_v47 = vld [vmem:[%s3089_s6] ss:$0 sm:$0xff] }
  0x58   : > { %2279 = vmatmul.mubr.msk.f32.vlgmr.msra.gmra.mxu0 %vm477_vm0, %v470_v5  ;;  %2292 = vmatprep.subr.mxu0 %v2696_v6  ;;  %v2171_v48 = vld [vmem:[%s3091_s8] ss:$0 sm:$0xff] }
  0x59   : > { %2296 = vmatprep.mubr.msk.f32.mxu0 %vm2697_vm1, %v2696_v6  ;;  %2293 = vmatpush3.msra.mxu0 %v470_v5 }
  0x5a   : > { %2294 = vmatprep.subr.mxu0 %v2696_v6  ;;  %2288 = vmatpush3.msra.mxu1 %v448_v29 }
  0x5b   : > { %2295 = vmatpush3.msra.mxu0 %v469_v2  ;;  %2290 = vmatmul.mubr.msk.f32.vlgmr.msra.gmra.mxu1 %vm477_vm0, %v470_v5 }
  0x5c   : > { %2310 = vmatprep.subr.mxu0 %v2696_v6  ;;  %2299 = vmatprep.subr.mxu1 %v2696_v6 }
  0x5d   : > { %2300 = vmatpush3.msra.mxu1 %v455_v32  ;;  %2307 = vmatprep.mubr.msk.f32.mxu1 %vm2697_vm1, %v2696_v6 }
  0x5e   : > { %2301 = vmatprep.subr.mxu1 %v2696_v6 }
  0x5f   : > { %2302 = vmatpush3.msra.mxu1 %v454_v33  ;;  %v460_v33 = vld [vmem:[#allocation8] sm:$0xff] }
  0x60   : > { %2303 = vmatprep.subr.mxu1 %v2696_v6 }
  0x61   : > { %2304 = vmatpush3.msra.mxu1 %v453_v35 }
  0x62   : > { %2305 = vmatprep.subr.mxu1 %v2696_v6 }
  0x63   : > { %2306 = vmatpush3.msra.mxu1 %v452_v36 }
 0x118   : > { %v2280_v8 = vpop.f32.mrf.mxu0 }
 0x119   : > { %v556_v9 = vadd.f32 %v2280_v8, %v2160_v7 }
 0x11a   : > { %v550_v10 = vpop.f32.mrf.mxu0 }
 0x11b   : > { %v2164_v11 = vmul.f32 -1.442695, %v556_v9  ;;  %v551_v12 = vadd.f32 %v2160_v7, %v550_v10  ;;  %v2291_v42 = vpop.f32.mrf.mxu1 }
 0x11c   : > { %v649_v43 = vadd.f32 %v2291_v42, %v2165_v41 }
 0x11d   : > { %v2163_v13 = vmul.f32 -1.442695, %v551_v12  ;;  %2470 = vpow2.f32 %v2164_v11  ;;  %v643_v44 = vpop.f32.mrf.mxu1 }
 0x11e   : > { %v644_v45 = vadd.f32 %v2165_v41, %v643_v44  ;;  %v2954_v55 = vmul.f32 0.35355338, %v649_v43 }
 0x11f   : > { %2472 = vpow2.f32 %v2163_v13 }
 0x120   : > { %v2931_v46 = vmul.f32 0.35355338, %v644_v45 }
 0x12a   : > { %v2471_v14 = vpop.eup %2470 }
 0x12b   : > { %v566_v17 = vadd.f32 1.0, %v2471_v14 }
 0x12c   : > { %v2473_v15 = vpop.eup %2472 }
 0x12d   : > { %v565_v16 = vadd.f32 1.0, %v2473_v15 }
 0x12f   : > { %2474 = vrcp.f32 %v565_v16 }
 0x130   : > { %2476 = vrcp.f32 %v566_v17 }
 0x13c   : > { %v2475_v18 = vpop.eup %2474 }
 0x13d   : > { %654 = vxpose.xlu0.b32.start [1/2] (short) (narrow) %v2475_v18, 8  ;;  %v2477_v19 = vpop.eup %2476 }
 0x141   : > { %655 = vxpose.xlu0.b32.end [2/2] (short) (narrow) %v2477_v19, 8 }
 0x16a   : > { %1110 = vrot.lane.b32.xlu0 %v2931_v46, %s2698_s19 }
 0x1b9   : > { %v670_v20 = vpop.trf.xlu0 }
 0x1ba   : > { %2297 = vmatmul.mubr.msk.f32.vlgmr.msra.gmra.mxu0 %vm686_vm2, %v670_v20 }
 0x1bb   : > { %2318 = vmatprep.mubr.msk.f32.mxu0 %vm2697_vm1, %v2696_v6  ;;  %2311 = vmatpush3.msra.mxu0 %v459_v28 }
 0x1bc   : > { %2312 = vmatprep.subr.mxu0 %v2696_v6 }
 0x1bd   : > { %2313 = vmatpush3.msra.mxu0 %v458_v30 }
 0x1be   : > { %2314 = vmatprep.subr.mxu0 %v2696_v6 }
 0x1bf   : > { %2315 = vmatpush3.msra.mxu0 %v457_v31 }
 0x1c0   : > { %2316 = vmatprep.subr.mxu0 %v2696_v6 }
 0x1c1   : > { %2317 = vmatpush3.msra.mxu0 %v456_v34 }
 0x1dc   : > { %v1111_v56 = vpop.permute.xlu0 %1110 }
 0x27a   : > { %v756_v21 = vpop.f32.mrf.mxu0 }
 0x27b   : > { %v760_v22 = vmul.f32 %v756_v21, %v756_v21 }
 0x27c   : > { %v2298_v23 = vpop.f32.mrf.mxu0 }
 0x27d   : > { %v761_v24 = vsel %vm477_vm0, %v760_v22, 0.0  ;;  %v461_v23 = vld [vmem:[#allocation8 + $0x8] sm:$0xff] }
 0x27e   : > { %762 = vadd.xlane.f32.xlu1 %v761_v24 }
 0x307   : > { %v763_v37 = vpop.xlane.xlu1 %762 }
 0x308   : > { %v764_v38 = vmax.f32 %v763_v37, 1e-24 }
 0x30a   : > { %2478 = vrsqrt.f32 %v764_v38 }
 0x317   : > { %v2479_v39 = vpop.eup %2478 }
 0x318   : > { %v766_v40 = vmul.f32 %v2479_v39, %v756_v21 }
 0x31a   : > { %2308 = vmatmul.mubr.msk.f32.vlgmr.msra.gmra.mxu1 %vm477_vm0, %v766_v40  ;;  %2319 = vmatmul.mubr.msk.f32.vlgmr.msra.gmra.mxu0 %vm477_vm0, %v766_v40 }
 0x31b   : > { %2323 = vmatprep.mubr.msk.f32.mxu1 %vm922_vm3, %v2931_v46 }
 0x3da   : > { %v842_v49 = vpop.f32.mrf.mxu1  ;;  %v918_v50 = vpop.f32.mrf.mxu0 }
 0x3db   : > { %v2943_v51 = vadd.f32 %v2169_v47, %v842_v49  ;;  %v2945_v52 = vadd.f32 %v2171_v48, %v918_v50 }
 0x3dc   : > { %v2309_v53 = vpop.f32.mrf.mxu1  ;;  %v2320_v54 = vpop.f32.mrf.mxu0 }
 0x3dd   : > { %1114 = vrot.lane.b32.xlu1 %v2943_v51, %s2698_s19  ;;  %2321 = vmatprep.subr.msk.mxu1 %vm922_vm3, %v2943_v51 }
 0x3de   : > { %2326 = vmatprep.subr.mxu0 %v2945_v52  ;;  %2322 = vmatpush3.xpose.msk.msra.mxu1 %vm922_vm3, %v2943_v51 }
 0x3df   : > { %2327 = vmatpush3.msra.mxu0 %v2945_v52 }
 0x3e1   : > { %1112 = vrot.lane.b32.xlu1 %v2954_v55, %s2698_s19  ;;  %2324 = vmatmul.mubr.msk.f32.vlgmr.msra.gmra.mxu1 %vm922_vm3, %v2954_v55 }
 0x3e2   : > { %2333 = vmatprep.mubr.msk.f32.mxu1 %vm922_vm3, %v1111_v56 }
 0x44f   : > { %v1115_v57 = vpop.permute.xlu1 %1114 }
 0x450   : > { %2331 = vmatprep.subr.msk.mxu1 %vm922_vm3, %v1115_v57 }
 0x451   : > { %2332 = vmatpush3.xpose.msk.msra.mxu1 %vm922_vm3, %v1115_v57 }
 0x452   : > { %2341 = vmatprep.subr.mxu1 %v461_v23 }
 0x453   : > { %v1113_v58 = vpop.permute.xlu1 %1112 }
 0x454   : > { %2334 = vmatmul.mubr.msk.f32.vlgmr.msra.gmra.mxu1 %vm922_vm3, %v1113_v58 }
 0x455   : > { %2342 = vmatpush3.msra.mxu1 %v461_v23 }
 0x4a1   : > { %v2325_v59 = vpop.f32.mrf.mxu1 }
 0x4a2   : > { %v1010_v60 = vsel %vm922_vm3, %v2325_v59, -inf }
 0x4a3   : > { %1011 = vmax.xlane.f32.xlu0 %v1010_v60  ;;  %v998_v61 = vpop.f32.mrf.mxu1 }
 0x4a4   : > { %v1007_v62 = vsel %vm922_vm3, %v998_v61, -inf }
 0x4a5   : > { %1008 = vmax.xlane.f32.xlu1 %v1007_v62 }
 0x514   : > { %v2335_v63 = vpop.f32.mrf.mxu1 }
 0x515   : > { %v1200_v2 = vsel %vm922_vm3, %v2335_v63, -inf }
 0x516   : > { %v1188_v0 = vpop.f32.mrf.mxu1 }
 0x517   : > { %v1197_v1 = vsel %vm922_vm3, %v1188_v0, -inf }
 0x518   : > { %1198 = vmax.xlane.f32.xlu1 %v1197_v1 }
 0x51c   : > { %1201 = vmax.xlane.f32.xlu1 %v1200_v2 }
 0x52c   : > { %v1012_v3 = vpop.xlane.xlu0 %1011 }
 0x52d   : > { %v1014_v4 = vsub.f32 %v2325_v59, %v1012_v3 }
 0x52e   : > { %v1009_v5 = vpop.xlane.xlu1 %1008 }
 0x52f   : > { %v1017_v6 = vmul.f32 1.442695, %v1014_v4  ;;  %v1013_v7 = vsub.f32 %v998_v61, %v1009_v5 }
 0x531   : > { %2480 = vpow2.f32 %v1017_v6  ;;  %v1015_v8 = vmul.f32 1.442695, %v1013_v7 }
 0x533   : > { %2482 = vpow2.f32 %v1015_v8  ;;  %v462_v8 = vld [vmem:[#allocation8 + $0x10] sm:$0xff] }
 0x53e   : > { %v2481_v9 = vpop.eup %2480 }
 0x53f   : > { %v1022_v10 = vsel %vm922_vm3, %v2481_v9, 0.0 }
 0x540   : > { %v2483_v11 = vpop.eup %2482  ;;  %1023 = vadd.xlane.f32.xlu1 %v1022_v10 }
 0x541   : > { %v1019_v12 = vsel %vm922_vm3, %v2483_v11, 0.0 }
 0x544   : > { %1020 = vadd.xlane.f32.xlu1 %v1019_v12 }
 0x5a1   : > { %v1199_v13 = vpop.xlane.xlu1 %1198 }
 0x5a2   : > { %v1203_v14 = vsub.f32 %v1188_v0, %v1199_v13 }
 0x5a4   : > { %v1205_v15 = vmul.f32 1.442695, %v1203_v14 }
 0x5a5   : > { %v1202_v16 = vpop.xlane.xlu1 %1201 }
 0x5a6   : > { %2484 = vpow2.f32 %v1205_v15  ;;  %v1204_v17 = vsub.f32 %v2335_v63, %v1202_v16 }
 0x5a8   : > { %v1207_v18 = vmul.f32 1.442695, %v1204_v17 }
 0x5aa   : > { %2486 = vpow2.f32 %v1207_v18 }
 0x5b3   : > { %v2485_v19 = vpop.eup %2484 }
 0x5b4   : > { %v1209_v20 = vsel %vm922_vm3, %v2485_v19, 0.0 }
 0x5b5   : > { %1210 = vadd.xlane.f32.xlu1 %v1209_v20 }
 0x5b7   : > { %v2487_v21 = vpop.eup %2486 }
 0x5b8   : > { %v1212_v22 = vsel %vm922_vm3, %v2487_v21, 0.0 }
 0x5b9   : > { %1213 = vadd.xlane.f32.xlu0 %v1212_v22 }
 0x5c6   : > { %1220 = vrot.lane.b32.xlu1 %v2945_v52, %s2698_s19  ;;  %s438_s19 = scalar_lea.vmem [#allocation10], %s2157_s13 }
 0x5c7   : > { %s2042_s26 = sshll.u32 %s438_s19, 4  ;;  %s3039_s26 = int_to_ptr.vmem [resolvable:$true] %s2042_s26 }
 0x5c9   : > { %v1024_v24 = vpop.xlane.xlu1 %1023 }
 0x5ca   : > { %1466 = vrot.lane.b32.xlu1 %v2931_v46, %s2699_s22  ;;  %2488 = vrcp.f32 %v1024_v24 }
 0x5cd   : > { %v1021_v25 = vpop.xlane.xlu1 %1020 }
 0x5ce   : > { %2490 = vrcp.f32 %v1021_v25  ;;  %1468 = vrot.lane.b32.xlu1 %v2954_v55, %s2699_s22 }
 0x5cf   : > { %1470 = vrot.lane.b32.xlu0 %v2943_v51, %s2699_s22 }
 0x5d7   : > { %v2489_v26 = vpop.eup %2488 }
 0x5d8   : > { %v1028_v29 = vmul.f32 %v2489_v26, %v2481_v9 }
 0x5db   : > { %v2491_v27 = vpop.eup %2490 }
 0x5dc   : > { %v1027_v28 = vmul.f32 %v2491_v27, %v2483_v11 }
 0x5de   : > { %2328 = vmatprep.mubr.msk.f32.mxu0 %vm922_vm3, %v1027_v28 }
 0x5df   : > { %2329 = vmatmul.mubr.msk.f32.vlgmr.msra.gmra.mxu0 %vm922_vm3, %v1028_v29 }
 0x63e   : > { %v1211_v30 = vpop.xlane.xlu1 %1210 }
 0x63f   : > { %2492 = vrcp.f32 %v1211_v30 }
 0x642   : > { %v1221_v31 = vpop.permute.xlu1 %1220  ;;  %v1214_v32 = vpop.xlane.xlu0 %1213 }
 0x643   : > { %2494 = vrcp.f32 %v1214_v32  ;;  %2336 = vmatprep.subr.mxu0 %v1221_v31 }
 0x644   : > { %2337 = vmatpush3.msra.mxu0 %v1221_v31 }
 0x645   : > { %2346 = vmatprep.subr.mxu0 %v460_v33 }
 0x646   : > { %v1471_v34 = vpop.permute.xlu0 %1470  ;;  %v1467_v42 = vpop.permute.xlu1 %1466 }
 0x647   : > { %2351 = vmatprep.subr.msk.mxu1 %vm922_vm3, %v1471_v34 }
 0x64a   : > { %v1469_v44 = vpop.permute.xlu1 %1468 }
 0x64c   : > { %v2493_v35 = vpop.eup %2492 }
 0x64d   : > { %v1217_v36 = vmul.f32 %v2493_v35, %v2485_v19 }
 0x64f   : > { %2338 = vmatprep.mubr.msk.f32.mxu0 %vm922_vm3, %v1217_v36  ;;  %v463_v36 = vld [vmem:[#allocation8 + $0x18] sm:$0xff] }
 0x650   : > { %v2495_v37 = vpop.eup %2494 }
 0x651   : > { %v1218_v38 = vmul.f32 %v2495_v37, %v2487_v21 }
 0x653   : > { %2339 = vmatmul.mubr.msk.f32.vlgmr.msra.gmra.mxu0 %vm922_vm3, %v1218_v38 }
 0x654   : > { %2347 = vmatpush3.msra.mxu0 %v460_v33 }
 0x69f   : > { %v2330_v39 = vpop.f32.mrf.mxu0 }
 0x6a1   : > { %v1101_v40 = vpop.f32.mrf.mxu0 }
 0x6a2   : > { %2348 = vmatprep.mubr.msk.f32.mxu0 %vm922_vm3, %v1101_v40 }
 0x6a3   : > { %2349 = vmatmul.mubr.msk.f32.vlgmr.msra.gmra.mxu0 %vm922_vm3, %v2330_v39 }
 0x713   : > { %v2340_v41 = vpop.f32.mrf.mxu0 }
 0x715   : > { %v1295_v43 = vpop.f32.mrf.mxu0 }
 0x716   : > { %2343 = vmatprep.mubr.msk.f32.mxu1 %vm922_vm3, %v1295_v43 }
 0x717   : > { %2344 = vmatmul.mubr.msk.f32.vlgmr.msra.gmra.mxu1 %vm922_vm3, %v2340_v41  ;;  %v2201_v41 = vld [vmem:[%s3093_s10] ss:$0 sm:$0xff] }
 0x718   : > { %2352 = vmatpush3.xpose.msk.msra.mxu1 %vm922_vm3, %v1471_v34  ;;  %2353 = vmatprep.mubr.msk.f32.mxu1 %vm922_vm3, %v1467_v42 }
 0x719   : > { %2361 = vmatprep.subr.mxu1 %v462_v8 }
 0x71b   : > { %2354 = vmatmul.mubr.msk.f32.vlgmr.msra.gmra.mxu1 %vm922_vm3, %v1469_v44 }
 0x71c   : > { %2362 = vmatpush3.msra.mxu1 %v462_v8 }
 0x763   : > { %v2350_v9 = vpop.f32.mrf.mxu0 }
 0x765   : > { %v1457_v10 = vpop.f32.mrf.mxu0 }
 0x7d7   : > { %v2993_v45 = vpop.f32.mrf.mxu1 }
 0x7d9   : > { %v2995_v47 = vpop.f32.mrf.mxu1 }
 0x7da   : > { %v1458_v40 = vadd.f32 %v1457_v10, %v2995_v47 }
 0x7db   : > { %v2355_v48 = vpop.f32.mrf.mxu1 }
 0x7dc   : > { %v1556_v49 = vsel %vm922_vm3, %v2355_v48, -inf }
 0x7dd   : > { %1557 = vmax.xlane.f32.xlu1 %v1556_v49  ;;  %v1544_v50 = vpop.f32.mrf.mxu1 }
 0x7de   : > { %v1553_v53 = vsel %vm922_vm3, %v1544_v50, -inf }
 0x7df   : > { %1554 = vmax.xlane.f32.xlu0 %v1553_v53 }
 0x7ee   : > { %1575 = vrot.lane.b32.xlu1 %v2945_v52, %s2699_s22  ;;  %s2616_s22 = scalar_lea.vmem %s3039_s26, 256 }
 0x7ef   : > { %p2617_p9 = scmp.ne.s32.totalorder %s3039_s26, %s2616_s22 }
 0x7f1   : > { %p2618_p12 = pnand %p2617_p9, %p2802_p5 }
 0x7f2   : > { %1742 = vrot.lane.b32.xlu1 %v2931_v46, %s2700_s24 }
 0x7f3   : > { %p2619_p13 = pneg %p2618_p12 }
 0x7f6   : > { %1744 = vrot.lane.b32.xlu1 %v2954_v55, %s2700_s24 }
 0x866   : > { %v1558_v54 = vpop.xlane.xlu1 %1557 }
 0x867   : > { %v1560_v56 = vsub.f32 %v2355_v48, %v1558_v54 }
 0x868   : > { %v1555_v57 = vpop.xlane.xlu0 %1554 }
 0x869   : > { %v1563_v58 = vmul.f32 1.442695, %v1560_v56  ;;  %v1559_v59 = vsub.f32 %v1544_v50, %v1555_v57 }
 0x86a   : > { %v1576_v60 = vpop.permute.xlu1 %1575 }
 0x86b   : > { %2496 = vpow2.f32 %v1563_v58  ;;  %v1561_v61 = vmul.f32 1.442695, %v1559_v59  ;;  %2356 = vmatprep.subr.mxu0 %v1576_v60 }
 0x86c   : > { %2357 = vmatpush3.msra.mxu0 %v1576_v60 }
 0x86d   : > { %2498 = vpow2.f32 %v1561_v61 }
 0x86e   : > { %v1743_v5 = vpop.permute.xlu1 %1742 }
 0x878   : > { %v2497_v62 = vpop.eup %2496 }
 0x879   : > { %v1568_v63 = vsel %vm922_vm3, %v2497_v62, 0.0 }
 0x87a   : > { %v2499_v0 = vpop.eup %2498  ;;  %1569 = vadd.xlane.f32.xlu0 %v1568_v63 }
 0x87b   : > { %v1565_v46 = vsel %vm922_vm3, %v2499_v0, 0.0 }
 0x87e   : > { %1566 = vadd.xlane.f32.xlu0 %v1565_v46 }
 0x894   : > { %1746 = vrot.lane.b32.xlu0 %v2943_v51, %s2700_s24  ;;  %v1745_v51 = vpop.permute.xlu1 %1744 }
 0x903   : > { %v1570_v55 = vpop.xlane.xlu0 %1569 }
 0x904   : > { %2500 = vrcp.f32 %v1570_v55 }
 0x907   : > { %v1567_v1 = vpop.xlane.xlu0 %1566 }
 0x908   : > { %2502 = vrcp.f32 %v1567_v1 }
 0x90b   : > { %v1747_v2 = vpop.permute.xlu0 %1746 }
 0x90c   : > { %2366 = vmatprep.subr.msk.mxu0 %vm922_vm3, %v1747_v2 }
 0x911   : > { %v2501_v3 = vpop.eup %2500 }
 0x912   : > { %v1574_v7 = vmul.f32 %v2501_v3, %v2497_v62 }
 0x915   : > { %v2503_v4 = vpop.eup %2502 }
 0x916   : > { %v1573_v6 = vmul.f32 %v2503_v4, %v2499_v0 }
 0x918   : > { %2358 = vmatprep.mubr.msk.f32.mxu0 %vm922_vm3, %v1573_v6 }
 0x919   : > { %2359 = vmatmul.mubr.msk.f32.vlgmr.msra.gmra.mxu0 %vm922_vm3, %v1574_v7 }
 0x91a   : > { %2367 = vmatpush3.xpose.msk.msra.mxu0 %vm922_vm3, %v1747_v2  ;;  %2368 = vmatprep.mubr.msk.f32.mxu0 %vm922_vm3, %v1743_v5 }
 0x91b   : > { %2376 = vmatprep.subr.mxu0 %v463_v36 }
 0x91d   : > { %2369 = vmatmul.mubr.msk.f32.vlgmr.msra.gmra.mxu0 %vm922_vm3, %v1745_v51 }
 0x91e   : > { %2377 = vmatpush3.msra.mxu0 %v463_v36 }
 0x9d9   : > { %v2360_v11 = vpop.f32.mrf.mxu0 }
 0x9db   : > { %v1650_v12 = vpop.f32.mrf.mxu0 }
 0x9dc   : > { %2363 = vmatprep.mubr.msk.f32.mxu1 %vm922_vm3, %v1650_v12 }
 0x9dd   : > { %2364 = vmatmul.mubr.msk.f32.vlgmr.msra.gmra.mxu1 %vm922_vm3, %v2360_v11  ;;  %v2370_v13 = vpop.f32.mrf.mxu0 }
 0x9de   : > { %v1832_v14 = vsel %vm922_vm3, %v2370_v13, -inf }
 0x9df   : > { %1833 = vmax.xlane.f32.xlu1 %v1832_v14  ;;  %v1820_v15 = vpop.f32.mrf.mxu0 }
 0x9e0   : > { %v1829_v16 = vsel %vm922_vm3, %v1820_v15, -inf }
 0x9e1   : > { %1830 = vmax.xlane.f32.xlu0 %v1829_v16 }
 0x9f0   : > { %1851 = vrot.lane.b32.xlu1 %v2945_v52, %s2700_s24  ;;  %v1463_v52 = vadd.f32 %v2350_v9, %v2993_v45  ;;  %s2701_s24 = smov [#allocation10]  }
 0x9f1   : > { %s2620_s13 = sshll.u32 %s2701_s24, 4  ;;  %s2621_s13 = int_to_ptr.vmem [resolvable:$false] %s2620_s13 }
 0x9f2   : > { %s2622_s25 = scalar_lea.vmem %s2621_s13, 512  ;;  %p2623_p4 = scmp.lt.s32.totalorder %s3039_s26, %s2621_s13 }
 0x9f3   : > { %p2624_p7 = scmp.lt.s32.totalorder %s2622_s25, %s2616_s22 }
 0x9f5   : > { %p2625_p8 = por %p2624_p7, %p2623_p4 }
 0x9f7   : > { %p2626_p11 = pnand %p2625_p8, %p2619_p13 }
 0xa68   : > { %v1834_v17 = vpop.xlane.xlu1 %1833 }
 0xa69   : > { %v1836_v18 = vsub.f32 %v2370_v13, %v1834_v17 }
 0xa6a   : > { %v1831_v19 = vpop.xlane.xlu0 %1830 }
 0xa6b   : > { %v1835_v20 = vsub.f32 %v1820_v15, %v1831_v19  ;;  %v1839_v22 = vmul.f32 1.442695, %v1836_v18 }
 0xa6c   : > { %v1852_v21 = vpop.permute.xlu1 %1851 }
 0xa6d   : > { %v1837_v23 = vmul.f32 1.442695, %v1835_v20  ;;  %2371 = vmatprep.subr.mxu1 %v1852_v21 }
 0xa6e   : > { %2372 = vmatpush3.msra.mxu1 %v1852_v21 }
 0xa6f   : > { %2504 = vpow2.f32 %v1837_v23 }
 0xa70   : > { %2506 = vpow2.f32 %v1839_v22 }
 0xa7c   : > { %v2505_v24 = vpop.eup %2504 }
 0xa7d   : > { %v1841_v25 = vsel %vm922_vm3, %v2505_v24, 0.0  ;;  %v2507_v26 = vpop.eup %2506 }
 0xa7e   : > { %1842 = vadd.xlane.f32.xlu0 %v1841_v25  ;;  %v1844_v27 = vsel %vm922_vm3, %v2507_v26, 0.0 }
 0xa82   : > { %1845 = vadd.xlane.f32.xlu0 %v1844_v27 }
 0xa9d   : > { %v2365_v28 = vpop.f32.mrf.mxu1 }
 0xa9e   : > { %v1741_v29 = vadd.f32 %v2365_v28, %v1463_v52 }
 0xa9f   : > { %v1731_v37 = vpop.f32.mrf.mxu1 }
 0xaa0   : > { %v1740_v43 = vadd.f32 %v1731_v37, %v1458_v40 }
 0xb07   : > { %v1843_v30 = vpop.xlane.xlu0 %1842 }
 0xb08   : > { %2508 = vrcp.f32 %v1843_v30 }
 0xb0b   : > { %v1846_v31 = vpop.xlane.xlu0 %1845 }
 0xb0c   : > { %2510 = vrcp.f32 %v1846_v31 }
 0xb15   : > { %v2509_v32 = vpop.eup %2508 }
 0xb16   : > { %v1849_v33 = vmul.f32 %v2509_v32, %v2505_v24 }
 0xb18   : > { %2373 = vmatprep.mubr.msk.f32.mxu1 %vm922_vm3, %v1849_v33 }
 0xb19   : > { %v2511_v34 = vpop.eup %2510 }
 0xb1a   : > { %v1850_v35 = vmul.f32 %v2511_v34, %v2507_v26 }
 0xb1c   : > { %2374 = vmatmul.mubr.msk.f32.vlgmr.msra.gmra.mxu1 %vm922_vm3, %v1850_v35 }
 0xbdc   : > { %v2375_v38 = vpop.f32.mrf.mxu1 }
 0xbde   : > { %v1926_v39 = vpop.f32.mrf.mxu1 }
 0xbdf   : > { %2378 = vmatprep.mubr.msk.f32.mxu0 %vm922_vm3, %v1926_v39 }
 0xbe0   : > { %2379 = vmatmul.mubr.msk.f32.vlgmr.msra.gmra.mxu0 %vm922_vm3, %v2375_v38 }
 0xca0   : > { %v2380_v42 = vpop.f32.mrf.mxu0 }
 0xca1   : > { %v2017_v44 = vadd.f32 %v2380_v42, %v1741_v29 }
 0xca2   : > { %v2007_v45 = vpop.f32.mrf.mxu0 }
 0xca3   : > { %v2025_v48 = vadd.f32 %v2201_v41, %v2017_v44  ;;  %v2016_v49 = vadd.f32 %v2007_v45, %v1740_v43 }
 0xca5   : > { %2027 = vst.msk [vmem:[%s438_s19 + $0x8] sm:$0xff] %vm477_vm0, %v2025_v48  ;;  %v2024_v47 = vadd.f32 %v2201_v41, %v2016_v49 }
 0xca7   : > { %2026 = vst.msk [vmem:[%s438_s19] sm:$0xff] %vm477_vm0, %v2024_v47 }
 0xca8   : > { %2629 = shalt.err (!%p2626_p11)
}
 0xca9   : > { %s2630_s29 = scalar_lea.hbm %s3037_s16, 256  ;;  %s2634_s19 = scalar_lea.hbm %s3094_s11, 512 }
 0xcaa   : > { %p2631_p0 = scmp.ne.s32.totalorder %s3037_s16, %s2630_s29  ;;  %p2635_p3 = scmp.lt.s32.totalorder %s3037_s16, %s3094_s11 }
 0xcab   : > { %p2636_p10 = scmp.lt.s32.totalorder %s2634_s19, %s2630_s29 }
 0xcac   : > { %p2632_p2 = pnand %p2631_p0, %p2802_p5 }
 0xcad   : > { %p2637_p9 = por %p2636_p10, %p2635_p3 }
 0xcae   : > { %p2633_p1 = pneg %p2632_p2 }
 0xcb0   : > { %p2638_p12 = pnand %p2637_p9, %p2633_p1 }
 0xcb2   : > { %2641 = shalt.err (!%p2638_p12)
}
 0xcb3   : > { %s2702_s22 = smov 128   ;;  %s2703_s24 = smov 8  }
 0xcb4   : > { %2397 = dma.vmem_to_hbm [thread:$0]  (%p2802_p5), %s3039_s26, 256, %s3037_s16, %s3043_s21, %s2702_s22, %s2702_s22, %s2703_s24  }
 0xcb5 PF: > { %p2424_p13 = scmp.ge.s32.totalorder %s2688_s20, 2  ;;  %s2057_s13 = sand.u32 1, %s2676_s17  }
 0xcb6   : > { %s2058_s25 = scalar_lea.sflag [#allocation4], %s2057_s13 }
 0xcb7   : > { %p2413_p4 = pnand %p2424_p13, %p2806_p6 }
 0xcb9   : > { %p2414_p7 = pneg %p2413_p4 }
 0xcbb   : > { %2671 = dma.done.wait (%p2414_p7), %s2058_s25, 256  }
 0xcbc   : > { %2673 = vsyncadd (%p2414_p7), %s2058_s25, 4294967040  ;;  %s3102_s29 = sld [smem:[#allocation15_spill]]  ;;  %p24_p8 = scmp.ge.s32.totalorder %s2789_s23, 4  }
 0xcbd   : > { %s3103_s19 = sld [smem:[#allocation16_spill]]  ;;  %s3104_s17 = smov %s2680_s18 }
 0xcbe   : > { %s3106_s20 = smov %s2789_s23  ;;  %26 = sbr.rel (!%p24_p8) target bundleno = 6 (0x6), region = 116 }
 0xcc2   : > { %s3105_s18 = smov %s3102_s29 }
 0xcc3   :  { %2063 = vsyncpa [#allocation3], 1 }
 0xcc4   :  { %2065 = vsyncpa [#allocation3 + $0x1], 1 }
 0xcc5   :  { %2066 = vsyncpa [#allocation6], 1 }
 0xcc6   :  { %2067 = vsyncpa [#allocation9], 1 }
 0xcc7   :  { %2068 = vsyncpa [#allocation4], 1 }
 0xcc8   :  { %2070 = vsyncpa [#allocation4 + $0x1], 1 }

</bundles_post_ra>
